<compile_context>
chip_gen: v6e
topology: v6e:2x2x1
jax: 0.10.0
libtpu: 0.0.40
codegen_flags: <defaults>
</compile_context>

<pallas_src>
import functools

import jax
import jax.numpy as jnp
from jax import lax
from jax.experimental import pallas as pl
from jax.experimental.pallas import tpu as pltpu

_LANES = 128
_SUB = 8
_NUM_PREDS = 7
_NUM_CORES = 2   # v7x megacore split; a harmless serial loop of 2 on v5e/v6e.


def _round_up(x, m):
    return (x + m - 1) // m * m


def _bce7_kernel(d0_ref, d1_ref, d2_ref, d3_ref, d4_ref, d5_ref, d6_ref,
                 lab_ref, out_ref, *, tr, tiles_per_core, n_elems,
                 needs_mask, binary_labels):
    """One grid step: accumulate per-prediction BCE partial sums for one row tile.

    d*_ref / lab_ref : (tr, 128) VMEM tiles (native dtype, cast to f32 here).
    out_ref          : (1, 7, 8, 128) f32 block, resident across the inner
                       (reduction) grid axis; one distinct block per core.
    """
    t = pl.program_id(1)

    @pl.when(t == 0)
    def _():
        out_ref[...] = jnp.zeros_like(out_ref)

    pred_refs = (d0_ref, d1_ref, d2_ref, d3_ref, d4_ref, d5_ref, d6_ref)
    y = lab_ref[...].astype(jnp.float32)

    def accumulate(mask):
        if binary_labels:
            take_p = y >= 0.5                      # hoisted, reused for 7 preds
        else:
            one_minus_y = 1.0 - y                  # hoisted, reused for 7 preds
        for i, p_ref in enumerate(pred_refs):
            p = p_ref[...].astype(jnp.float32)
            if binary_labels:
                # Hard-label fast path: 1 EUP log per element instead of 2.
                x_sel = jnp.where(take_p, p, 1.0 - p)
                per_elem = -jnp.maximum(jnp.log(x_sel), -100.0)
            else:
                # Exact torch.nn.BCELoss formulation (soft labels supported).
                log_p = jnp.maximum(jnp.log(p), -100.0)
                log_1mp = jnp.maximum(jnp.log(1.0 - p), -100.0)
                per_elem = -(y * log_p + one_minus_y * log_1mp)
            if mask is not None:
                # Select (not multiply): garbage/NaN in padded rows can't leak.
                per_elem = jnp.where(mask, per_elem, 0.0)
            # Fold (tr,128) -> (8,128) with pure VPU adds; the cross-lane
            # collapse to scalars happens outside the kernel on a tiny array.
            out_ref[0, i] += per_elem.reshape(-1, _SUB, _LANES).sum(axis=0)

    if not needs_mask:
        accumulate(None)
    else:
        c = pl.program_id(0)
        # Logical (un-clamped) tile index: the input index_map clamps the DMA
        # to stay in-bounds, but masking uses the logical element index so
        # duplicated / partially-garbage rows contribute exactly zero.
        row_tile = c * tiles_per_core + t
        tile_start = row_tile * (tr * _LANES)
        is_full = (tile_start + tr * _LANES) <= n_elems

        @pl.when(is_full)
        def _():
            accumulate(None)

        @pl.when(jnp.logical_not(is_full))
        def _():
            row = lax.broadcasted_iota(jnp.int32, (tr, _LANES), 0)
            lane = lax.broadcasted_iota(jnp.int32, (tr, _LANES), 1)
            elem = tile_start + row * _LANES + lane
            accumulate(elem < n_elems)


@functools.partial(jax.jit, static_argnames=("max_row_tile", "binary_labels"))
def u2net_custom_loss(d0, d1, d2, d3, d4, d5, d6, labels_v, *,
                      max_row_tile=2048, binary_labels=False):
    """Pallas TPU U2NetCustomLoss: returns (loss0, loss0 + ... + loss6).

    binary_labels=True enables a single-log fast path that is only exact when
    labels are guaranteed to be in {0, 1}; default keeps exact BCELoss parity.
    """
    preds = (d0, d1, d2, d3, d4, d5, d6)
    n_elems = int(labels_v.size)

    rows = -(-n_elems // _LANES)
    padded_elems = rows * _LANES

    def _prep(x):
        # Keep native dtype in HBM (bf16 stays bf16); cast to f32 in-kernel.
        flat = jnp.ravel(x)
        if padded_elems != n_elems:
            # Tiny tail pad only so the lane-dense reshape is legal; the pad
            # contents are irrelevant (masked in-kernel).
            flat = jnp.pad(flat, (0, padded_elems - n_elems))
        return flat.reshape(rows, _LANES)

    preds2 = [_prep(d) for d in preds]
    labels2 = _prep(labels_v)

    tr = min(_round_up(rows, _SUB), max(_SUB, _round_up(max_row_tile, _SUB)))
    tiles = -(-rows // tr)
    ncores = _NUM_CORES if tiles >= _NUM_CORES else 1
    tiles_per_core = -(-tiles // ncores)
    covered = ncores * tiles_per_core * tr * _LANES
    needs_mask = covered != n_elems
    last_block = tiles - 1

    def in_index(c, t):
        # Clamp so the DMA never targets a fully out-of-range block; the
        # kernel masks by the logical element index instead.
        return (jnp.minimum(c * tiles_per_core + t, last_block), 0)

    tile_spec = pl.BlockSpec((tr, _LANES), in_index)
    out_spec = pl.BlockSpec((1, _NUM_PREDS, _SUB, _LANES),
                            lambda c, t: (c, 0, 0, 0))

    kernel = functools.partial(
        _bce7_kernel, tr=tr, tiles_per_core=tiles_per_core, n_elems=n_elems,
        needs_mask=needs_mask, binary_labels=binary_labels)

    bytes_in = n_elems * (sum(x.dtype.itemsize for x in preds)
                          + labels_v.dtype.itemsize)
    cost = pl.CostEstimate(
        flops=8 * _NUM_PREDS * n_elems,
        transcendentals=(1 if binary_labels else 2) * _NUM_PREDS * n_elems,
        bytes_accessed=bytes_in + ncores * _NUM_PREDS * _SUB * _LANES * 4,
    )

    partials = pl.pallas_call(
        kernel,
        out_shape=jax.ShapeDtypeStruct(
            (ncores, _NUM_PREDS, _SUB, _LANES), jnp.float32),
        grid_spec=pltpu.PrefetchScalarGridSpec(
            num_scalar_prefetch=0,
            grid=(ncores, tiles_per_core),
            in_specs=[tile_spec] * (_NUM_PREDS + 1),
            out_specs=out_spec,
        ),
        compiler_params=pltpu.CompilerParams(
            dimension_semantics=("parallel", "arbitrary"),
            vmem_limit_bytes=48 * 1024 * 1024),
        cost_estimate=cost,
    )(*preds2, labels2)

    per_pred = jnp.sum(partials, axis=(0, 2, 3)) * (1.0 / n_elems)  # (7,)
    loss0 = per_pred[0]
    loss = jnp.sum(per_pred)
    return loss0, loss


def _bce_ref(x, y):
    lp = jnp.maximum(jnp.log(x), -100.0)
    l1p = jnp.maximum(jnp.log(1.0 - x), -100.0)
    return jnp.mean(-(y * lp + (1.0 - y) * l1p))


if __name__ == "__main__":
    def check(shape, key, max_row_tile=2048, binary=False, hard_labels=True):
        keys = jax.random.split(key, 8)
        ds = [jax.nn.sigmoid(jax.random.normal(keys[i], shape, jnp.float32))
              for i in range(_NUM_PREDS)]
        if hard_labels:
            labels = (jax.random.uniform(keys[7], shape) > 0.5).astype(
                jnp.float32)
        else:
            labels = jax.random.uniform(keys[7], shape).astype(jnp.float32)
        loss0, loss = u2net_custom_loss(*ds, labels,
                                        max_row_tile=max_row_tile,
                                        binary_labels=binary)
        jax.block_until_ready((loss0, loss))
        refs = jnp.stack([_bce_ref(d, labels) for d in ds])
        assert jnp.allclose(loss0, refs[0], rtol=2e-5, atol=1e-5), \
            (loss0, refs[0])
        assert jnp.allclose(loss, jnp.sum(refs), rtol=2e-5, atol=1e-5), \
            (loss, jnp.sum(refs))

    key = jax.random.PRNGKey(0)
    k1, k2, k3 = jax.random.split(key, 3)

    # Primary: U2Net side-output-like shapes (B, 1, H, W), exact BCE path.
    check((2, 1, 16, 16), k1)
    # Hard-label single-log fast path on the same shape.
    check((2, 1, 16, 16), k1, binary=True)
    # Multi-tile + both grid cores, ragged last tile (mask path), soft labels.
    check((2, 1, 60, 128), k2, max_row_tile=32, hard_labels=False)
    # Multi-tile, exactly divisible (no-mask fast path).
    check((2, 1, 64, 128), k3, max_row_tile=32)

    print("KERNEL_OK")
</pallas_src>

<mosaic_0001>
module attributes {stable_mosaic.version = 11 : i64} {
  func.func @_bce7_kernel(%arg0: i32, %arg1: i32, %arg2: memref<8x128xf32, #tpu.memory_space<vmem>>, %arg3: memref<8x128xf32, #tpu.memory_space<vmem>>, %arg4: memref<8x128xf32, #tpu.memory_space<vmem>>, %arg5: memref<8x128xf32, #tpu.memory_space<vmem>>, %arg6: memref<8x128xf32, #tpu.memory_space<vmem>>, %arg7: memref<8x128xf32, #tpu.memory_space<vmem>>, %arg8: memref<8x128xf32, #tpu.memory_space<vmem>>, %arg9: memref<8x128xf32, #tpu.memory_space<vmem>>, %arg10: memref<1x7x8x128xf32, #tpu.memory_space<vmem>>) attributes {dimension_semantics = [#tpu.dimension_semantics<parallel>, #tpu.dimension_semantics<arbitrary>], iteration_bounds = array<i64: 1, 1>, scalar_prefetch = 0 : i64, scratch_operands = 0 : i64, tpu.core_type = #tpu.core_type<tc>, window_params = [{transform_indices = @transform_0, window_bounds = array<i64: 8, 128>}, {transform_indices = @transform_1, window_bounds = array<i64: 8, 128>}, {transform_indices = @transform_2, window_bounds = array<i64: 8, 128>}, {transform_indices = @transform_3, window_bounds = array<i64: 8, 128>}, {transform_indices = @transform_4, window_bounds = array<i64: 8, 128>}, {transform_indices = @transform_5, window_bounds = array<i64: 8, 128>}, {transform_indices = @transform_6, window_bounds = array<i64: 8, 128>}, {transform_indices = @transform_7, window_bounds = array<i64: 8, 128>}, {transform_indices = @transform_8, window_bounds = array<i64: 1, 7, 8, 128>}]} {
    %c0_i32 = arith.constant 0 : i32
    %0 = arith.cmpi eq, %arg1, %c0_i32 : i32
    %1 = arith.extui %0 : i1 to i32
    %c0_i32_0 = arith.constant 0 : i32
    %2 = arith.cmpi ne, %1, %c0_i32_0 : i32
    scf.if %2 {
      %cst = arith.constant 0.000000e+00 : f32
      %14 = vector.broadcast %cst : f32 to vector<1x7x8x128xf32>
      %c0_5 = arith.constant 0 : index
      %c0_6 = arith.constant 0 : index
      %c0_7 = arith.constant 0 : index
      %c0_8 = arith.constant 0 : index
      %15 = vector.load %arg10[%c0_5, %c0_6, %c0_7, %c0_8] : memref<1x7x8x128xf32, #tpu.memory_space<vmem>>, vector<1x7x8x128xf32>
      tpu.vector_store %arg10[%c0_5, %c0_6, %c0_7, %c0_8], %14 {strides = array<i32>} : memref<1x7x8x128xf32, #tpu.memory_space<vmem>>, vector<1x7x8x128xf32>,
    } else {
    }
    %c0 = arith.constant 0 : index
    %c0_1 = arith.constant 0 : index
    %3 = vector.load %arg9[%c0, %c0_1] : memref<8x128xf32, #tpu.memory_space<vmem>>, vector<8x128xf32>
    %c1_i32 = arith.constant 1 : i32
    %4 = arith.muli %arg0, %c1_i32 : i32
    %5 = arith.addi %4, %arg1 : i32
    %c1024_i32 = arith.constant 1024 : i32
    %6 = arith.muli %5, %c1024_i32 : i32
    %c1024_i32_2 = arith.constant 1024 : i32
    %7 = arith.addi %6, %c1024_i32_2 : i32
    %c512_i32 = arith.constant 512 : i32
    %8 = arith.cmpi sle, %7, %c512_i32 : i32
    %9 = arith.extui %8 : i1 to i32
    %c0_i32_3 = arith.constant 0 : i32
    %10 = arith.cmpi ne, %9, %c0_i32_3 : i32
    scf.if %10 {
      %cst = arith.constant 1.000000e+00 : f32
      %14 = vector.broadcast %cst : f32 to vector<8x128xf32>
      %15 = arith.subf %14, %3 : vector<8x128xf32>
      %c0_5 = arith.constant 0 : index
      %c0_6 = arith.constant 0 : index
      %16 = vector.load %arg2[%c0_5, %c0_6] : memref<8x128xf32, #tpu.memory_space<vmem>>, vector<8x128xf32>
      %17 = math.log %16 : vector<8x128xf32>
      %cst_7 = arith.constant -1.000000e+02 : f32
      %18 = vector.broadcast %cst_7 : f32 to vector<8x128xf32>
      %19 = arith.maximumf %17, %18 : vector<8x128xf32>
      %cst_8 = arith.constant 1.000000e+00 : f32
      %20 = vector.broadcast %cst_8 : f32 to vector<8x128xf32>
      %21 = arith.subf %20, %16 : vector<8x128xf32>
      %22 = math.log %21 : vector<8x128xf32>
      %cst_9 = arith.constant -1.000000e+02 : f32
      %23 = vector.broadcast %cst_9 : f32 to vector<8x128xf32>
      %24 = arith.maximumf %22, %23 : vector<8x128xf32>
      %25 = arith.mulf %3, %19 : vector<8x128xf32>
      %26 = arith.mulf %15, %24 : vector<8x128xf32>
      %27 = arith.addf %25, %26 : vector<8x128xf32>
      %cst_10 = arith.constant 0.000000e+00 : f32
      %28 = vector.broadcast %cst_10 : f32 to vector<8x128xf32>
      %29 = arith.subf %28, %27 : vector<8x128xf32>
      %c0_11 = arith.constant 0 : index
      %c0_12 = arith.constant 0 : index
      %c0_13 = arith.constant 0 : index
      %c0_14 = arith.constant 0 : index
      %30 = vector.load %arg10[%c0_11, %c0_12, %c0_13, %c0_14] : memref<1x7x8x128xf32, #tpu.memory_space<vmem>>, vector<1x1x8x128xf32>
      %31 = vector.shape_cast %30 : vector<1x1x8x128xf32> to vector<8x128xf32>
      %32 = vector.shape_cast %29 : vector<8x128xf32> to vector<1x8x128xf32>
      %cst_15 = arith.constant dense<0.000000e+00> : vector<8x128xf32>
      %33 = vector.multi_reduction <add>, %32, %cst_15 [0] : vector<1x8x128xf32> to vector<8x128xf32>
      %34 = arith.addf %31, %33 : vector<8x128xf32>
      %c0_16 = arith.constant 0 : index
      %c0_17 = arith.constant 0 : index
      %c0_18 = arith.constant 0 : index
      %c0_19 = arith.constant 0 : index
      %35 = vector.load %arg10[%c0_16, %c0_17, %c0_18, %c0_19] : memref<1x7x8x128xf32, #tpu.memory_space<vmem>>, vector<1x1x8x128xf32>
      %36 = vector.shape_cast %35 : vector<1x1x8x128xf32> to vector<8x128xf32>
      %37 = vector.shape_cast %34 : vector<8x128xf32> to vector<1x1x8x128xf32>
      tpu.vector_store %arg10[%c0_16, %c0_17, %c0_18, %c0_19], %37 {strides = array<i32>} : memref<1x7x8x128xf32, #tpu.memory_space<vmem>>, vector<1x1x8x128xf32>,
      %c0_20 = arith.constant 0 : index
      %c0_21 = arith.constant 0 : index
      %38 = vector.load %arg3[%c0_20, %c0_21] : memref<8x128xf32, #tpu.memory_space<vmem>>, vector<8x128xf32>
      %39 = math.log %38 : vector<8x128xf32>
      %cst_22 = arith.constant -1.000000e+02 : f32
      %40 = vector.broadcast %cst_22 : f32 to vector<8x128xf32>
      %41 = arith.maximumf %39, %40 : vector<8x128xf32>
      %cst_23 = arith.constant 1.000000e+00 : f32
      %42 = vector.broadcast %cst_23 : f32 to vector<8x128xf32>
      %43 = arith.subf %42, %38 : vector<8x128xf32>
      %44 = math.log %43 : vector<8x128xf32>
      %cst_24 = arith.constant -1.000000e+02 : f32
      %45 = vector.broadcast %cst_24 : f32 to vector<8x128xf32>
      %46 = arith.maximumf %44, %45 : vector<8x128xf32>
      %47 = arith.mulf %3, %41 : vector<8x128xf32>
      %48 = arith.mulf %15, %46 : vector<8x128xf32>
      %49 = arith.addf %47, %48 : vector<8x128xf32>
      %cst_25 = arith.constant 0.000000e+00 : f32
      %50 = vector.broadcast %cst_25 : f32 to vector<8x128xf32>
      %51 = arith.subf %50, %49 : vector<8x128xf32>
      %c0_26 = arith.constant 0 : index
      %c1 = arith.constant 1 : index
      %c0_27 = arith.constant 0 : index
      %c0_28 = arith.constant 0 : index
      %52 = vector.load %arg10[%c0_26, %c1, %c0_27, %c0_28] : memref<1x7x8x128xf32, #tpu.memory_space<vmem>>, vector<1x1x8x128xf32>
      %53 = vector.shape_cast %52 : vector<1x1x8x128xf32> to vector<8x128xf32>
      %54 = vector.shape_cast %51 : vector<8x128xf32> to vector<1x8x128xf32>
      %cst_29 = arith.constant dense<0.000000e+00> : vector<8x128xf32>
      %55 = vector.multi_reduction <add>, %54, %cst_29 [0] : vector<1x8x128xf32> to vector<8x128xf32>
      %56 = arith.addf %53, %55 : vector<8x128xf32>
      %c0_30 = arith.constant 0 : index
      %c1_31 = arith.constant 1 : index
      %c0_32 = arith.constant 0 : index
      %c0_33 = arith.constant 0 : index
      %57 = vector.load %arg10[%c0_30, %c1_31, %c0_32, %c0_33] : memref<1x7x8x128xf32, #tpu.memory_space<vmem>>, vector<1x1x8x128xf32>
      %58 = vector.shape_cast %57 : vector<1x1x8x128xf32> to vector<8x128xf32>
      %59 = vector.shape_cast %56 : vector<8x128xf32> to vector<1x1x8x128xf32>
      tpu.vector_store %arg10[%c0_30, %c1_31, %c0_32, %c0_33], %59 {strides = array<i32>} : memref<1x7x8x128xf32, #tpu.memory_space<vmem>>, vector<1x1x8x128xf32>,
      %c0_34 = arith.constant 0 : index
      %c0_35 = arith.constant 0 : index
      %60 = vector.load %arg4[%c0_34, %c0_35] : memref<8x128xf32, #tpu.memory_space<vmem>>, vector<8x128xf32>
      %61 = math.log %60 : vector<8x128xf32>
      %cst_36 = arith.constant -1.000000e+02 : f32
      %62 = vector.broadcast %cst_36 : f32 to vector<8x128xf32>
      %63 = arith.maximumf %61, %62 : vector<8x128xf32>
      %cst_37 = arith.constant 1.000000e+00 : f32
      %64 = vector.broadcast %cst_37 : f32 to vector<8x128xf32>
      %65 = arith.subf %64, %60 : vector<8x128xf32>
      %66 = math.log %65 : vector<8x128xf32>
      %cst_38 = arith.constant -1.000000e+02 : f32
      %67 = vector.broadcast %cst_38 : f32 to vector<8x128xf32>
      %68 = arith.maximumf %66, %67 : vector<8x128xf32>
      %69 = arith.mulf %3, %63 : vector<8x128xf32>
      %70 = arith.mulf %15, %68 : vector<8x128xf32>
      %71 = arith.addf %69, %70 : vector<8x128xf32>
      %cst_39 = arith.constant 0.000000e+00 : f32
      %72 = vector.broadcast %cst_39 : f32 to vector<8x128xf32>
      %73 = arith.subf %72, %71 : vector<8x128xf32>
      %c0_40 = arith.constant 0 : index
      %c2 = arith.constant 2 : index
      %c0_41 = arith.constant 0 : index
      %c0_42 = arith.constant 0 : index
      %74 = vector.load %arg10[%c0_40, %c2, %c0_41, %c0_42] : memref<1x7x8x128xf32, #tpu.memory_space<vmem>>, vector<1x1x8x128xf32>
      %75 = vector.shape_cast %74 : vector<1x1x8x128xf32> to vector<8x128xf32>
      %76 = vector.shape_cast %73 : vector<8x128xf32> to vector<1x8x128xf32>
      %cst_43 = arith.constant dense<0.000000e+00> : vector<8x128xf32>
      %77 = vector.multi_reduction <add>, %76, %cst_43 [0] : vector<1x8x128xf32> to vector<8x128xf32>
      %78 = arith.addf %75, %77 : vector<8x128xf32>
      %c0_44 = arith.constant 0 : index
      %c2_45 = arith.constant 2 : index
      %c0_46 = arith.constant 0 : index
      %c0_47 = arith.constant 0 : index
      %79 = vector.load %arg10[%c0_44, %c2_45, %c0_46, %c0_47] : memref<1x7x8x128xf32, #tpu.memory_space<vmem>>, vector<1x1x8x128xf32>
      %80 = vector.shape_cast %79 : vector<1x1x8x128xf32> to vector<8x128xf32>
      %81 = vector.shape_cast %78 : vector<8x128xf32> to vector<1x1x8x128xf32>
      tpu.vector_store %arg10[%c0_44, %c2_45, %c0_46, %c0_47], %81 {strides = array<i32>} : memref<1x7x8x128xf32, #tpu.memory_space<vmem>>, vector<1x1x8x128xf32>,
      %c0_48 = arith.constant 0 : index
      %c0_49 = arith.constant 0 : index
      %82 = vector.load %arg5[%c0_48, %c0_49] : memref<8x128xf32, #tpu.memory_space<vmem>>, vector<8x128xf32>
      %83 = math.log %82 : vector<8x128xf32>
      %cst_50 = arith.constant -1.000000e+02 : f32
      %84 = vector.broadcast %cst_50 : f32 to vector<8x128xf32>
      %85 = arith.maximumf %83, %84 : vector<8x128xf32>
      %cst_51 = arith.constant 1.000000e+00 : f32
      %86 = vector.broadcast %cst_51 : f32 to vector<8x128xf32>
      %87 = arith.subf %86, %82 : vector<8x128xf32>
      %88 = math.log %87 : vector<8x128xf32>
      %cst_52 = arith.constant -1.000000e+02 : f32
      %89 = vector.broadcast %cst_52 : f32 to vector<8x128xf32>
      %90 = arith.maximumf %88, %89 : vector<8x128xf32>
      %91 = arith.mulf %3, %85 : vector<8x128xf32>
      %92 = arith.mulf %15, %90 : vector<8x128xf32>
      %93 = arith.addf %91, %92 : vector<8x128xf32>
      %cst_53 = arith.constant 0.000000e+00 : f32
      %94 = vector.broadcast %cst_53 : f32 to vector<8x128xf32>
      %95 = arith.subf %94, %93 : vector<8x128xf32>
      %c0_54 = arith.constant 0 : index
      %c3 = arith.constant 3 : index
      %c0_55 = arith.constant 0 : index
      %c0_56 = arith.constant 0 : index
      %96 = vector.load %arg10[%c0_54, %c3, %c0_55, %c0_56] : memref<1x7x8x128xf32, #tpu.memory_space<vmem>>, vector<1x1x8x128xf32>
      %97 = vector.shape_cast %96 : vector<1x1x8x128xf32> to vector<8x128xf32>
      %98 = vector.shape_cast %95 : vector<8x128xf32> to vector<1x8x128xf32>
      %cst_57 = arith.constant dense<0.000000e+00> : vector<8x128xf32>
      %99 = vector.multi_reduction <add>, %98, %cst_57 [0] : vector<1x8x128xf32> to vector<8x128xf32>
      %100 = arith.addf %97, %99 : vector<8x128xf32>
      %c0_58 = arith.constant 0 : index
      %c3_59 = arith.constant 3 : index
      %c0_60 = arith.constant 0 : index
      %c0_61 = arith.constant 0 : index
      %101 = vector.load %arg10[%c0_58, %c3_59, %c0_60, %c0_61] : memref<1x7x8x128xf32, #tpu.memory_space<vmem>>, vector<1x1x8x128xf32>
      %102 = vector.shape_cast %101 : vector<1x1x8x128xf32> to vector<8x128xf32>
      %103 = vector.shape_cast %100 : vector<8x128xf32> to vector<1x1x8x128xf32>
      tpu.vector_store %arg10[%c0_58, %c3_59, %c0_60, %c0_61], %103 {strides = array<i32>} : memref<1x7x8x128xf32, #tpu.memory_space<vmem>>, vector<1x1x8x128xf32>,
      %c0_62 = arith.constant 0 : index
      %c0_63 = arith.constant 0 : index
      %104 = vector.load %arg6[%c0_62, %c0_63] : memref<8x128xf32, #tpu.memory_space<vmem>>, vector<8x128xf32>
      %105 = math.log %104 : vector<8x128xf32>
      %cst_64 = arith.constant -1.000000e+02 : f32
      %106 = vector.broadcast %cst_64 : f32 to vector<8x128xf32>
      %107 = arith.maximumf %105, %106 : vector<8x128xf32>
      %cst_65 = arith.constant 1.000000e+00 : f32
      %108 = vector.broadcast %cst_65 : f32 to vector<8x128xf32>
      %109 = arith.subf %108, %104 : vector<8x128xf32>
      %110 = math.log %109 : vector<8x128xf32>
      %cst_66 = arith.constant -1.000000e+02 : f32
      %111 = vector.broadcast %cst_66 : f32 to vector<8x128xf32>
      %112 = arith.maximumf %110, %111 : vector<8x128xf32>
      %113 = arith.mulf %3, %107 : vector<8x128xf32>
      %114 = arith.mulf %15, %112 : vector<8x128xf32>
      %115 = arith.addf %113, %114 : vector<8x128xf32>
      %cst_67 = arith.constant 0.000000e+00 : f32
      %116 = vector.broadcast %cst_67 : f32 to vector<8x128xf32>
      %117 = arith.subf %116, %115 : vector<8x128xf32>
      %c0_68 = arith.constant 0 : index
      %c4 = arith.constant 4 : index
      %c0_69 = arith.constant 0 : index
      %c0_70 = arith.constant 0 : index
      %118 = vector.load %arg10[%c0_68, %c4, %c0_69, %c0_70] : memref<1x7x8x128xf32, #tpu.memory_space<vmem>>, vector<1x1x8x128xf32>
      %119 = vector.shape_cast %118 : vector<1x1x8x128xf32> to vector<8x128xf32>
      %120 = vector.shape_cast %117 : vector<8x128xf32> to vector<1x8x128xf32>
      %cst_71 = arith.constant dense<0.000000e+00> : vector<8x128xf32>
      %121 = vector.multi_reduction <add>, %120, %cst_71 [0] : vector<1x8x128xf32> to vector<8x128xf32>
      %122 = arith.addf %119, %121 : vector<8x128xf32>
      %c0_72 = arith.constant 0 : index
      %c4_73 = arith.constant 4 : index
      %c0_74 = arith.constant 0 : index
      %c0_75 = arith.constant 0 : index
      %123 = vector.load %arg10[%c0_72, %c4_73, %c0_74, %c0_75] : memref<1x7x8x128xf32, #tpu.memory_space<vmem>>, vector<1x1x8x128xf32>
      %124 = vector.shape_cast %123 : vector<1x1x8x128xf32> to vector<8x128xf32>
      %125 = vector.shape_cast %122 : vector<8x128xf32> to vector<1x1x8x128xf32>
      tpu.vector_store %arg10[%c0_72, %c4_73, %c0_74, %c0_75], %125 {strides = array<i32>} : memref<1x7x8x128xf32, #tpu.memory_space<vmem>>, vector<1x1x8x128xf32>,
      %c0_76 = arith.constant 0 : index
      %c0_77 = arith.constant 0 : index
      %126 = vector.load %arg7[%c0_76, %c0_77] : memref<8x128xf32, #tpu.memory_space<vmem>>, vector<8x128xf32>
      %127 = math.log %126 : vector<8x128xf32>
      %cst_78 = arith.constant -1.000000e+02 : f32
      %128 = vector.broadcast %cst_78 : f32 to vector<8x128xf32>
      %129 = arith.maximumf %127, %128 : vector<8x128xf32>
      %cst_79 = arith.constant 1.000000e+00 : f32
      %130 = vector.broadcast %cst_79 : f32 to vector<8x128xf32>
      %131 = arith.subf %130, %126 : vector<8x128xf32>
      %132 = math.log %131 : vector<8x128xf32>
      %cst_80 = arith.constant -1.000000e+02 : f32
      %133 = vector.broadcast %cst_80 : f32 to vector<8x128xf32>
      %134 = arith.maximumf %132, %133 : vector<8x128xf32>
      %135 = arith.mulf %3, %129 : vector<8x128xf32>
      %136 = arith.mulf %15, %134 : vector<8x128xf32>
      %137 = arith.addf %135, %136 : vector<8x128xf32>
      %cst_81 = arith.constant 0.000000e+00 : f32
      %138 = vector.broadcast %cst_81 : f32 to vector<8x128xf32>
      %139 = arith.subf %138, %137 : vector<8x128xf32>
      %c0_82 = arith.constant 0 : index
      %c5 = arith.constant 5 : index
      %c0_83 = arith.constant 0 : index
      %c0_84 = arith.constant 0 : index
      %140 = vector.load %arg10[%c0_82, %c5, %c0_83, %c0_84] : memref<1x7x8x128xf32, #tpu.memory_space<vmem>>, vector<1x1x8x128xf32>
      %141 = vector.shape_cast %140 : vector<1x1x8x128xf32> to vector<8x128xf32>
      %142 = vector.shape_cast %139 : vector<8x128xf32> to vector<1x8x128xf32>
      %cst_85 = arith.constant dense<0.000000e+00> : vector<8x128xf32>
      %143 = vector.multi_reduction <add>, %142, %cst_85 [0] : vector<1x8x128xf32> to vector<8x128xf32>
      %144 = arith.addf %141, %143 : vector<8x128xf32>
      %c0_86 = arith.constant 0 : index
      %c5_87 = arith.constant 5 : index
      %c0_88 = arith.constant 0 : index
      %c0_89 = arith.constant 0 : index
      %145 = vector.load %arg10[%c0_86, %c5_87, %c0_88, %c0_89] : memref<1x7x8x128xf32, #tpu.memory_space<vmem>>, vector<1x1x8x128xf32>
      %146 = vector.shape_cast %145 : vector<1x1x8x128xf32> to vector<8x128xf32>
      %147 = vector.shape_cast %144 : vector<8x128xf32> to vector<1x1x8x128xf32>
      tpu.vector_store %arg10[%c0_86, %c5_87, %c0_88, %c0_89], %147 {strides = array<i32>} : memref<1x7x8x128xf32, #tpu.memory_space<vmem>>, vector<1x1x8x128xf32>,
      %c0_90 = arith.constant 0 : index
      %c0_91 = arith.constant 0 : index
      %148 = vector.load %arg8[%c0_90, %c0_91] : memref<8x128xf32, #tpu.memory_space<vmem>>, vector<8x128xf32>
      %149 = math.log %148 : vector<8x128xf32>
      %cst_92 = arith.constant -1.000000e+02 : f32
      %150 = vector.broadcast %cst_92 : f32 to vector<8x128xf32>
      %151 = arith.maximumf %149, %150 : vector<8x128xf32>
      %cst_93 = arith.constant 1.000000e+00 : f32
      %152 = vector.broadcast %cst_93 : f32 to vector<8x128xf32>
      %153 = arith.subf %152, %148 : vector<8x128xf32>
      %154 = math.log %153 : vector<8x128xf32>
      %cst_94 = arith.constant -1.000000e+02 : f32
      %155 = vector.broadcast %cst_94 : f32 to vector<8x128xf32>
      %156 = arith.maximumf %154, %155 : vector<8x128xf32>
      %157 = arith.mulf %3, %151 : vector<8x128xf32>
      %158 = arith.mulf %15, %156 : vector<8x128xf32>
      %159 = arith.addf %157, %158 : vector<8x128xf32>
      %cst_95 = arith.constant 0.000000e+00 : f32
      %160 = vector.broadcast %cst_95 : f32 to vector<8x128xf32>
      %161 = arith.subf %160, %159 : vector<8x128xf32>
      %c0_96 = arith.constant 0 : index
      %c6 = arith.constant 6 : index
      %c0_97 = arith.constant 0 : index
      %c0_98 = arith.constant 0 : index
      %162 = vector.load %arg10[%c0_96, %c6, %c0_97, %c0_98] : memref<1x7x8x128xf32, #tpu.memory_space<vmem>>, vector<1x1x8x128xf32>
      %163 = vector.shape_cast %162 : vector<1x1x8x128xf32> to vector<8x128xf32>
      %164 = vector.shape_cast %161 : vector<8x128xf32> to vector<1x8x128xf32>
      %cst_99 = arith.constant dense<0.000000e+00> : vector<8x128xf32>
      %165 = vector.multi_reduction <add>, %164, %cst_99 [0] : vector<1x8x128xf32> to vector<8x128xf32>
      %166 = arith.addf %163, %165 : vector<8x128xf32>
      %c0_100 = arith.constant 0 : index
      %c6_101 = arith.constant 6 : index
      %c0_102 = arith.constant 0 : index
      %c0_103 = arith.constant 0 : index
      %167 = vector.load %arg10[%c0_100, %c6_101, %c0_102, %c0_103] : memref<1x7x8x128xf32, #tpu.memory_space<vmem>>, vector<1x1x8x128xf32>
      %168 = vector.shape_cast %167 : vector<1x1x8x128xf32> to vector<8x128xf32>
      %169 = vector.shape_cast %166 : vector<8x128xf32> to vector<1x1x8x128xf32>
      tpu.vector_store %arg10[%c0_100, %c6_101, %c0_102, %c0_103], %169 {strides = array<i32>} : memref<1x7x8x128xf32, #tpu.memory_space<vmem>>, vector<1x1x8x128xf32>,
    } else {
    }
    %true = arith.constant true
    %11 = arith.xori %8, %true : i1
    %12 = arith.extui %11 : i1 to i32
    %c0_i32_4 = arith.constant 0 : i32
    %13 = arith.cmpi ne, %12, %c0_i32_4 : i32
    scf.if %13 {
      %14 = tpu.iota {dimensions = array<i32: 0>} : vector<8x128xi32>
      %15 = tpu.iota {dimensions = array<i32: 1>} : vector<8x128xi32>
      %c128_i32 = arith.constant 128 : i32
      %16 = vector.broadcast %c128_i32 : i32 to vector<8x128xi32>
      %17 = arith.muli %14, %16 : vector<8x128xi32>
      %18 = vector.broadcast %6 : i32 to vector<8x128xi32>
      %19 = arith.addi %18, %17 : vector<8x128xi32>
      %20 = arith.addi %19, %15 : vector<8x128xi32>
      %c512_i32_5 = arith.constant 512 : i32
      %21 = vector.broadcast %c512_i32_5 : i32 to vector<8x128xi32>
      %22 = arith.cmpi slt, %20, %21 : vector<8x128xi32>
      %cst = arith.constant 1.000000e+00 : f32
      %23 = vector.broadcast %cst : f32 to vector<8x128xf32>
      %24 = arith.subf %23, %3 : vector<8x128xf32>
      %c0_6 = arith.constant 0 : index
      %c0_7 = arith.constant 0 : index
      %25 = vector.load %arg2[%c0_6, %c0_7] : memref<8x128xf32, #tpu.memory_space<vmem>>, vector<8x128xf32>
      %26 = math.log %25 : vector<8x128xf32>
      %cst_8 = arith.constant -1.000000e+02 : f32
      %27 = vector.broadcast %cst_8 : f32 to vector<8x128xf32>
      %28 = arith.maximumf %26, %27 : vector<8x128xf32>
      %cst_9 = arith.constant 1.000000e+00 : f32
      %29 = vector.broadcast %cst_9 : f32 to vector<8x128xf32>
      %30 = arith.subf %29, %25 : vector<8x128xf32>
      %31 = math.log %30 : vector<8x128xf32>
      %cst_10 = arith.constant -1.000000e+02 : f32
      %32 = vector.broadcast %cst_10 : f32 to vector<8x128xf32>
      %33 = arith.maximumf %31, %32 : vector<8x128xf32>
      %34 = arith.mulf %3, %28 : vector<8x128xf32>
      %35 = arith.mulf %24, %33 : vector<8x128xf32>
      %36 = arith.addf %34, %35 : vector<8x128xf32>
      %cst_11 = arith.constant 0.000000e+00 : f32
      %37 = vector.broadcast %cst_11 : f32 to vector<8x128xf32>
      %38 = arith.subf %37, %36 : vector<8x128xf32>
      %cst_12 = arith.constant 0.000000e+00 : f32
      %39 = vector.broadcast %cst_12 : f32 to vector<8x128xf32>
      %40 = arith.select %22, %38, %39 : vector<8x128xi1>, vector<8x128xf32>
      %c0_13 = arith.constant 0 : index
      %c0_14 = arith.constant 0 : index
      %c0_15 = arith.constant 0 : index
      %c0_16 = arith.constant 0 : index
      %41 = vector.load %arg10[%c0_13, %c0_14, %c0_15, %c0_16] : memref<1x7x8x128xf32, #tpu.memory_space<vmem>>, vector<1x1x8x128xf32>
      %42 = vector.shape_cast %41 : vector<1x1x8x128xf32> to vector<8x128xf32>
      %43 = vector.shape_cast %40 : vector<8x128xf32> to vector<1x8x128xf32>
      %cst_17 = arith.constant dense<0.000000e+00> : vector<8x128xf32>
      %44 = vector.multi_reduction <add>, %43, %cst_17 [0] : vector<1x8x128xf32> to vector<8x128xf32>
      %45 = arith.addf %42, %44 : vector<8x128xf32>
      %c0_18 = arith.constant 0 : index
      %c0_19 = arith.constant 0 : index
      %c0_20 = arith.constant 0 : index
      %c0_21 = arith.constant 0 : index
      %46 = vector.load %arg10[%c0_18, %c0_19, %c0_20, %c0_21] : memref<1x7x8x128xf32, #tpu.memory_space<vmem>>, vector<1x1x8x128xf32>
      %47 = vector.shape_cast %46 : vector<1x1x8x128xf32> to vector<8x128xf32>
      %48 = vector.shape_cast %45 : vector<8x128xf32> to vector<1x1x8x128xf32>
      tpu.vector_store %arg10[%c0_18, %c0_19, %c0_20, %c0_21], %48 {strides = array<i32>} : memref<1x7x8x128xf32, #tpu.memory_space<vmem>>, vector<1x1x8x128xf32>,
      %c0_22 = arith.constant 0 : index
      %c0_23 = arith.constant 0 : index
      %49 = vector.load %arg3[%c0_22, %c0_23] : memref<8x128xf32, #tpu.memory_space<vmem>>, vector<8x128xf32>
      %50 = math.log %49 : vector<8x128xf32>
      %cst_24 = arith.constant -1.000000e+02 : f32
      %51 = vector.broadcast %cst_24 : f32 to vector<8x128xf32>
      %52 = arith.maximumf %50, %51 : vector<8x128xf32>
      %cst_25 = arith.constant 1.000000e+00 : f32
      %53 = vector.broadcast %cst_25 : f32 to vector<8x128xf32>
      %54 = arith.subf %53, %49 : vector<8x128xf32>
      %55 = math.log %54 : vector<8x128xf32>
      %cst_26 = arith.constant -1.000000e+02 : f32
      %56 = vector.broadcast %cst_26 : f32 to vector<8x128xf32>
      %57 = arith.maximumf %55, %56 : vector<8x128xf32>
      %58 = arith.mulf %3, %52 : vector<8x128xf32>
      %59 = arith.mulf %24, %57 : vector<8x128xf32>
      %60 = arith.addf %58, %59 : vector<8x128xf32>
      %cst_27 = arith.constant 0.000000e+00 : f32
      %61 = vector.broadcast %cst_27 : f32 to vector<8x128xf32>
      %62 = arith.subf %61, %60 : vector<8x128xf32>
      %cst_28 = arith.constant 0.000000e+00 : f32
      %63 = vector.broadcast %cst_28 : f32 to vector<8x128xf32>
      %64 = arith.select %22, %62, %63 : vector<8x128xi1>, vector<8x128xf32>
      %c0_29 = arith.constant 0 : index
      %c1 = arith.constant 1 : index
      %c0_30 = arith.constant 0 : index
      %c0_31 = arith.constant 0 : index
      %65 = vector.load %arg10[%c0_29, %c1, %c0_30, %c0_31] : memref<1x7x8x128xf32, #tpu.memory_space<vmem>>, vector<1x1x8x128xf32>
      %66 = vector.shape_cast %65 : vector<1x1x8x128xf32> to vector<8x128xf32>
      %67 = vector.shape_cast %64 : vector<8x128xf32> to vector<1x8x128xf32>
      %cst_32 = arith.constant dense<0.000000e+00> : vector<8x128xf32>
      %68 = vector.multi_reduction <add>, %67, %cst_32 [0] : vector<1x8x128xf32> to vector<8x128xf32>
      %69 = arith.addf %66, %68 : vector<8x128xf32>
      %c0_33 = arith.constant 0 : index
      %c1_34 = arith.constant 1 : index
      %c0_35 = arith.constant 0 : index
      %c0_36 = arith.constant 0 : index
      %70 = vector.load %arg10[%c0_33, %c1_34, %c0_35, %c0_36] : memref<1x7x8x128xf32, #tpu.memory_space<vmem>>, vector<1x1x8x128xf32>
      %71 = vector.shape_cast %70 : vector<1x1x8x128xf32> to vector<8x128xf32>
      %72 = vector.shape_cast %69 : vector<8x128xf32> to vector<1x1x8x128xf32>
      tpu.vector_store %arg10[%c0_33, %c1_34, %c0_35, %c0_36], %72 {strides = array<i32>} : memref<1x7x8x128xf32, #tpu.memory_space<vmem>>, vector<1x1x8x128xf32>,
      %c0_37 = arith.constant 0 : index
      %c0_38 = arith.constant 0 : index
      %73 = vector.load %arg4[%c0_37, %c0_38] : memref<8x128xf32, #tpu.memory_space<vmem>>, vector<8x128xf32>
      %74 = math.log %73 : vector<8x128xf32>
      %cst_39 = arith.constant -1.000000e+02 : f32
      %75 = vector.broadcast %cst_39 : f32 to vector<8x128xf32>
      %76 = arith.maximumf %74, %75 : vector<8x128xf32>
      %cst_40 = arith.constant 1.000000e+00 : f32
      %77 = vector.broadcast %cst_40 : f32 to vector<8x128xf32>
      %78 = arith.subf %77, %73 : vector<8x128xf32>
      %79 = math.log %78 : vector<8x128xf32>
      %cst_41 = arith.constant -1.000000e+02 : f32
      %80 = vector.broadcast %cst_41 : f32 to vector<8x128xf32>
      %81 = arith.maximumf %79, %80 : vector<8x128xf32>
      %82 = arith.mulf %3, %76 : vector<8x128xf32>
      %83 = arith.mulf %24, %81 : vector<8x128xf32>
      %84 = arith.addf %82, %83 : vector<8x128xf32>
      %cst_42 = arith.constant 0.000000e+00 : f32
      %85 = vector.broadcast %cst_42 : f32 to vector<8x128xf32>
      %86 = arith.subf %85, %84 : vector<8x128xf32>
      %cst_43 = arith.constant 0.000000e+00 : f32
      %87 = vector.broadcast %cst_43 : f32 to vector<8x128xf32>
      %88 = arith.select %22, %86, %87 : vector<8x128xi1>, vector<8x128xf32>
      %c0_44 = arith.constant 0 : index
      %c2 = arith.constant 2 : index
      %c0_45 = arith.constant 0 : index
      %c0_46 = arith.constant 0 : index
      %89 = vector.load %arg10[%c0_44, %c2, %c0_45, %c0_46] : memref<1x7x8x128xf32, #tpu.memory_space<vmem>>, vector<1x1x8x128xf32>
      %90 = vector.shape_cast %89 : vector<1x1x8x128xf32> to vector<8x128xf32>
      %91 = vector.shape_cast %88 : vector<8x128xf32> to vector<1x8x128xf32>
      %cst_47 = arith.constant dense<0.000000e+00> : vector<8x128xf32>
      %92 = vector.multi_reduction <add>, %91, %cst_47 [0] : vector<1x8x128xf32> to vector<8x128xf32>
      %93 = arith.addf %90, %92 : vector<8x128xf32>
      %c0_48 = arith.constant 0 : index
      %c2_49 = arith.constant 2 : index
      %c0_50 = arith.constant 0 : index
      %c0_51 = arith.constant 0 : index
      %94 = vector.load %arg10[%c0_48, %c2_49, %c0_50, %c0_51] : memref<1x7x8x128xf32, #tpu.memory_space<vmem>>, vector<1x1x8x128xf32>
      %95 = vector.shape_cast %94 : vector<1x1x8x128xf32> to vector<8x128xf32>
      %96 = vector.shape_cast %93 : vector<8x128xf32> to vector<1x1x8x128xf32>
      tpu.vector_store %arg10[%c0_48, %c2_49, %c0_50, %c0_51], %96 {strides = array<i32>} : memref<1x7x8x128xf32, #tpu.memory_space<vmem>>, vector<1x1x8x128xf32>,
      %c0_52 = arith.constant 0 : index
      %c0_53 = arith.constant 0 : index
      %97 = vector.load %arg5[%c0_52, %c0_53] : memref<8x128xf32, #tpu.memory_space<vmem>>, vector<8x128xf32>
      %98 = math.log %97 : vector<8x128xf32>
      %cst_54 = arith.constant -1.000000e+02 : f32
      %99 = vector.broadcast %cst_54 : f32 to vector<8x128xf32>
      %100 = arith.maximumf %98, %99 : vector<8x128xf32>
      %cst_55 = arith.constant 1.000000e+00 : f32
      %101 = vector.broadcast %cst_55 : f32 to vector<8x128xf32>
      %102 = arith.subf %101, %97 : vector<8x128xf32>
      %103 = math.log %102 : vector<8x128xf32>
      %cst_56 = arith.constant -1.000000e+02 : f32
      %104 = vector.broadcast %cst_56 : f32 to vector<8x128xf32>
      %105 = arith.maximumf %103, %104 : vector<8x128xf32>
      %106 = arith.mulf %3, %100 : vector<8x128xf32>
      %107 = arith.mulf %24, %105 : vector<8x128xf32>
      %108 = arith.addf %106, %107 : vector<8x128xf32>
      %cst_57 = arith.constant 0.000000e+00 : f32
      %109 = vector.broadcast %cst_57 : f32 to vector<8x128xf32>
      %110 = arith.subf %109, %108 : vector<8x128xf32>
      %cst_58 = arith.constant 0.000000e+00 : f32
      %111 = vector.broadcast %cst_58 : f32 to vector<8x128xf32>
      %112 = arith.select %22, %110, %111 : vector<8x128xi1>, vector<8x128xf32>
      %c0_59 = arith.constant 0 : index
      %c3 = arith.constant 3 : index
      %c0_60 = arith.constant 0 : index
      %c0_61 = arith.constant 0 : index
      %113 = vector.load %arg10[%c0_59, %c3, %c0_60, %c0_61] : memref<1x7x8x128xf32, #tpu.memory_space<vmem>>, vector<1x1x8x128xf32>
      %114 = vector.shape_cast %113 : vector<1x1x8x128xf32> to vector<8x128xf32>
      %115 = vector.shape_cast %112 : vector<8x128xf32> to vector<1x8x128xf32>
      %cst_62 = arith.constant dense<0.000000e+00> : vector<8x128xf32>
      %116 = vector.multi_reduction <add>, %115, %cst_62 [0] : vector<1x8x128xf32> to vector<8x128xf32>
      %117 = arith.addf %114, %116 : vector<8x128xf32>
      %c0_63 = arith.constant 0 : index
      %c3_64 = arith.constant 3 : index
      %c0_65 = arith.constant 0 : index
      %c0_66 = arith.constant 0 : index
      %118 = vector.load %arg10[%c0_63, %c3_64, %c0_65, %c0_66] : memref<1x7x8x128xf32, #tpu.memory_space<vmem>>, vector<1x1x8x128xf32>
      %119 = vector.shape_cast %118 : vector<1x1x8x128xf32> to vector<8x128xf32>
      %120 = vector.shape_cast %117 : vector<8x128xf32> to vector<1x1x8x128xf32>
      tpu.vector_store %arg10[%c0_63, %c3_64, %c0_65, %c0_66], %120 {strides = array<i32>} : memref<1x7x8x128xf32, #tpu.memory_space<vmem>>, vector<1x1x8x128xf32>,
      %c0_67 = arith.constant 0 : index
      %c0_68 = arith.constant 0 : index
      %121 = vector.load %arg6[%c0_67, %c0_68] : memref<8x128xf32, #tpu.memory_space<vmem>>, vector<8x128xf32>
      %122 = math.log %121 : vector<8x128xf32>
      %cst_69 = arith.constant -1.000000e+02 : f32
      %123 = vector.broadcast %cst_69 : f32 to vector<8x128xf32>
      %124 = arith.maximumf %122, %123 : vector<8x128xf32>
      %cst_70 = arith.constant 1.000000e+00 : f32
      %125 = vector.broadcast %cst_70 : f32 to vector<8x128xf32>
      %126 = arith.subf %125, %121 : vector<8x128xf32>
      %127 = math.log %126 : vector<8x128xf32>
      %cst_71 = arith.constant -1.000000e+02 : f32
      %128 = vector.broadcast %cst_71 : f32 to vector<8x128xf32>
      %129 = arith.maximumf %127, %128 : vector<8x128xf32>
      %130 = arith.mulf %3, %124 : vector<8x128xf32>
      %131 = arith.mulf %24, %129 : vector<8x128xf32>
      %132 = arith.addf %130, %131 : vector<8x128xf32>
      %cst_72 = arith.constant 0.000000e+00 : f32
      %133 = vector.broadcast %cst_72 : f32 to vector<8x128xf32>
      %134 = arith.subf %133, %132 : vector<8x128xf32>
      %cst_73 = arith.constant 0.000000e+00 : f32
      %135 = vector.broadcast %cst_73 : f32 to vector<8x128xf32>
      %136 = arith.select %22, %134, %135 : vector<8x128xi1>, vector<8x128xf32>
      %c0_74 = arith.constant 0 : index
      %c4 = arith.constant 4 : index
      %c0_75 = arith.constant 0 : index
      %c0_76 = arith.constant 0 : index
      %137 = vector.load %arg10[%c0_74, %c4, %c0_75, %c0_76] : memref<1x7x8x128xf32, #tpu.memory_space<vmem>>, vector<1x1x8x128xf32>
      %138 = vector.shape_cast %137 : vector<1x1x8x128xf32> to vector<8x128xf32>
      %139 = vector.shape_cast %136 : vector<8x128xf32> to vector<1x8x128xf32>
      %cst_77 = arith.constant dense<0.000000e+00> : vector<8x128xf32>
      %140 = vector.multi_reduction <add>, %139, %cst_77 [0] : vector<1x8x128xf32> to vector<8x128xf32>
      %141 = arith.addf %138, %140 : vector<8x128xf32>
      %c0_78 = arith.constant 0 : index
      %c4_79 = arith.constant 4 : index
      %c0_80 = arith.constant 0 : index
      %c0_81 = arith.constant 0 : index
      %142 = vector.load %arg10[%c0_78, %c4_79, %c0_80, %c0_81] : memref<1x7x8x128xf32, #tpu.memory_space<vmem>>, vector<1x1x8x128xf32>
      %143 = vector.shape_cast %142 : vector<1x1x8x128xf32> to vector<8x128xf32>
      %144 = vector.shape_cast %141 : vector<8x128xf32> to vector<1x1x8x128xf32>
      tpu.vector_store %arg10[%c0_78, %c4_79, %c0_80, %c0_81], %144 {strides = array<i32>} : memref<1x7x8x128xf32, #tpu.memory_space<vmem>>, vector<1x1x8x128xf32>,
      %c0_82 = arith.constant 0 : index
      %c0_83 = arith.constant 0 : index
      %145 = vector.load %arg7[%c0_82, %c0_83] : memref<8x128xf32, #tpu.memory_space<vmem>>, vector<8x128xf32>
      %146 = math.log %145 : vector<8x128xf32>
      %cst_84 = arith.constant -1.000000e+02 : f32
      %147 = vector.broadcast %cst_84 : f32 to vector<8x128xf32>
      %148 = arith.maximumf %146, %147 : vector<8x128xf32>
      %cst_85 = arith.constant 1.000000e+00 : f32
      %149 = vector.broadcast %cst_85 : f32 to vector<8x128xf32>
      %150 = arith.subf %149, %145 : vector<8x128xf32>
      %151 = math.log %150 : vector<8x128xf32>
      %cst_86 = arith.constant -1.000000e+02 : f32
      %152 = vector.broadcast %cst_86 : f32 to vector<8x128xf32>
      %153 = arith.maximumf %151, %152 : vector<8x128xf32>
      %154 = arith.mulf %3, %148 : vector<8x128xf32>
      %155 = arith.mulf %24, %153 : vector<8x128xf32>
      %156 = arith.addf %154, %155 : vector<8x128xf32>
      %cst_87 = arith.constant 0.000000e+00 : f32
      %157 = vector.broadcast %cst_87 : f32 to vector<8x128xf32>
      %158 = arith.subf %157, %156 : vector<8x128xf32>
      %cst_88 = arith.constant 0.000000e+00 : f32
      %159 = vector.broadcast %cst_88 : f32 to vector<8x128xf32>
      %160 = arith.select %22, %158, %159 : vector<8x128xi1>, vector<8x128xf32>
      %c0_89 = arith.constant 0 : index
      %c5 = arith.constant 5 : index
      %c0_90 = arith.constant 0 : index
      %c0_91 = arith.constant 0 : index
      %161 = vector.load %arg10[%c0_89, %c5, %c0_90, %c0_91] : memref<1x7x8x128xf32, #tpu.memory_space<vmem>>, vector<1x1x8x128xf32>
      %162 = vector.shape_cast %161 : vector<1x1x8x128xf32> to vector<8x128xf32>
      %163 = vector.shape_cast %160 : vector<8x128xf32> to vector<1x8x128xf32>
      %cst_92 = arith.constant dense<0.000000e+00> : vector<8x128xf32>
      %164 = vector.multi_reduction <add>, %163, %cst_92 [0] : vector<1x8x128xf32> to vector<8x128xf32>
      %165 = arith.addf %162, %164 : vector<8x128xf32>
      %c0_93 = arith.constant 0 : index
      %c5_94 = arith.constant 5 : index
      %c0_95 = arith.constant 0 : index
      %c0_96 = arith.constant 0 : index
      %166 = vector.load %arg10[%c0_93, %c5_94, %c0_95, %c0_96] : memref<1x7x8x128xf32, #tpu.memory_space<vmem>>, vector<1x1x8x128xf32>
      %167 = vector.shape_cast %166 : vector<1x1x8x128xf32> to vector<8x128xf32>
      %168 = vector.shape_cast %165 : vector<8x128xf32> to vector<1x1x8x128xf32>
      tpu.vector_store %arg10[%c0_93, %c5_94, %c0_95, %c0_96], %168 {strides = array<i32>} : memref<1x7x8x128xf32, #tpu.memory_space<vmem>>, vector<1x1x8x128xf32>,
      %c0_97 = arith.constant 0 : index
      %c0_98 = arith.constant 0 : index
      %169 = vector.load %arg8[%c0_97, %c0_98] : memref<8x128xf32, #tpu.memory_space<vmem>>, vector<8x128xf32>
      %170 = math.log %169 : vector<8x128xf32>
      %cst_99 = arith.constant -1.000000e+02 : f32
      %171 = vector.broadcast %cst_99 : f32 to vector<8x128xf32>
      %172 = arith.maximumf %170, %171 : vector<8x128xf32>
      %cst_100 = arith.constant 1.000000e+00 : f32
      %173 = vector.broadcast %cst_100 : f32 to vector<8x128xf32>
      %174 = arith.subf %173, %169 : vector<8x128xf32>
      %175 = math.log %174 : vector<8x128xf32>
      %cst_101 = arith.constant -1.000000e+02 : f32
      %176 = vector.broadcast %cst_101 : f32 to vector<8x128xf32>
      %177 = arith.maximumf %175, %176 : vector<8x128xf32>
      %178 = arith.mulf %3, %172 : vector<8x128xf32>
      %179 = arith.mulf %24, %177 : vector<8x128xf32>
      %180 = arith.addf %178, %179 : vector<8x128xf32>
      %cst_102 = arith.constant 0.000000e+00 : f32
      %181 = vector.broadcast %cst_102 : f32 to vector<8x128xf32>
      %182 = arith.subf %181, %180 : vector<8x128xf32>
      %cst_103 = arith.constant 0.000000e+00 : f32
      %183 = vector.broadcast %cst_103 : f32 to vector<8x128xf32>
      %184 = arith.select %22, %182, %183 : vector<8x128xi1>, vector<8x128xf32>
      %c0_104 = arith.constant 0 : index
      %c6 = arith.constant 6 : index
      %c0_105 = arith.constant 0 : index
      %c0_106 = arith.constant 0 : index
      %185 = vector.load %arg10[%c0_104, %c6, %c0_105, %c0_106] : memref<1x7x8x128xf32, #tpu.memory_space<vmem>>, vector<1x1x8x128xf32>
      %186 = vector.shape_cast %185 : vector<1x1x8x128xf32> to vector<8x128xf32>
      %187 = vector.shape_cast %184 : vector<8x128xf32> to vector<1x8x128xf32>
      %cst_107 = arith.constant dense<0.000000e+00> : vector<8x128xf32>
      %188 = vector.multi_reduction <add>, %187, %cst_107 [0] : vector<1x8x128xf32> to vector<8x128xf32>
      %189 = arith.addf %186, %188 : vector<8x128xf32>
      %c0_108 = arith.constant 0 : index
      %c6_109 = arith.constant 6 : index
      %c0_110 = arith.constant 0 : index
      %c0_111 = arith.constant 0 : index
      %190 = vector.load %arg10[%c0_108, %c6_109, %c0_110, %c0_111] : memref<1x7x8x128xf32, #tpu.memory_space<vmem>>, vector<1x1x8x128xf32>
      %191 = vector.shape_cast %190 : vector<1x1x8x128xf32> to vector<8x128xf32>
      %192 = vector.shape_cast %189 : vector<8x128xf32> to vector<1x1x8x128xf32>
      tpu.vector_store %arg10[%c0_108, %c6_109, %c0_110, %c0_111], %192 {strides = array<i32>} : memref<1x7x8x128xf32, #tpu.memory_space<vmem>>, vector<1x1x8x128xf32>,
    } else {
    }
    return
  }
  func.func @transform_0(%arg0: i32, %arg1: i32) -> (i32, i32) {
    %c1_i32 = arith.constant 1 : i32
    %0 = arith.muli %arg0, %c1_i32 : i32
    %1 = arith.addi %0, %arg1 : i32
    %c0_i32 = arith.constant 0 : i32
    %2 = arith.minsi %1, %c0_i32 : i32
    %c0_i32_0 = arith.constant 0 : i32
    %c0_i32_1 = arith.constant 0 : i32
    return %2, %c0_i32_0 : i32, i32
  }
  func.func @transform_1(%arg0: i32, %arg1: i32) -> (i32, i32) {
    %c1_i32 = arith.constant 1 : i32
    %0 = arith.muli %arg0, %c1_i32 : i32
    %1 = arith.addi %0, %arg1 : i32
    %c0_i32 = arith.constant 0 : i32
    %2 = arith.minsi %1, %c0_i32 : i32
    %c0_i32_0 = arith.constant 0 : i32
    %c0_i32_1 = arith.constant 0 : i32
    return %2, %c0_i32_0 : i32, i32
  }
  func.func @transform_2(%arg0: i32, %arg1: i32) -> (i32, i32) {
    %c1_i32 = arith.constant 1 : i32
    %0 = arith.muli %arg0, %c1_i32 : i32
    %1 = arith.addi %0, %arg1 : i32
    %c0_i32 = arith.constant 0 : i32
    %2 = arith.minsi %1, %c0_i32 : i32
    %c0_i32_0 = arith.constant 0 : i32
    %c0_i32_1 = arith.constant 0 : i32
    return %2, %c0_i32_0 : i32, i32
  }
  func.func @transform_3(%arg0: i32, %arg1: i32) -> (i32, i32) {
    %c1_i32 = arith.constant 1 : i32
    %0 = arith.muli %arg0, %c1_i32 : i32
    %1 = arith.addi %0, %arg1 : i32
    %c0_i32 = arith.constant 0 : i32
    %2 = arith.minsi %1, %c0_i32 : i32
    %c0_i32_0 = arith.constant 0 : i32
    %c0_i32_1 = arith.constant 0 : i32
    return %2, %c0_i32_0 : i32, i32
  }
  func.func @transform_4(%arg0: i32, %arg1: i32) -> (i32, i32) {
    %c1_i32 = arith.constant 1 : i32
    %0 = arith.muli %arg0, %c1_i32 : i32
    %1 = arith.addi %0, %arg1 : i32
    %c0_i32 = arith.constant 0 : i32
    %2 = arith.minsi %1, %c0_i32 : i32
    %c0_i32_0 = arith.constant 0 : i32
    %c0_i32_1 = arith.constant 0 : i32
    return %2, %c0_i32_0 : i32, i32
  }
  func.func @transform_5(%arg0: i32, %arg1: i32) -> (i32, i32) {
    %c1_i32 = arith.constant 1 : i32
    %0 = arith.muli %arg0, %c1_i32 : i32
    %1 = arith.addi %0, %arg1 : i32
    %c0_i32 = arith.constant 0 : i32
    %2 = arith.minsi %1, %c0_i32 : i32
    %c0_i32_0 = arith.constant 0 : i32
    %c0_i32_1 = arith.constant 0 : i32
    return %2, %c0_i32_0 : i32, i32
  }
  func.func @transform_6(%arg0: i32, %arg1: i32) -> (i32, i32) {
    %c1_i32 = arith.constant 1 : i32
    %0 = arith.muli %arg0, %c1_i32 : i32
    %1 = arith.addi %0, %arg1 : i32
    %c0_i32 = arith.constant 0 : i32
    %2 = arith.minsi %1, %c0_i32 : i32
    %c0_i32_0 = arith.constant 0 : i32
    %c0_i32_1 = arith.constant 0 : i32
    return %2, %c0_i32_0 : i32, i32
  }
  func.func @transform_7(%arg0: i32, %arg1: i32) -> (i32, i32) {
    %c1_i32 = arith.constant 1 : i32
    %0 = arith.muli %arg0, %c1_i32 : i32
    %1 = arith.addi %0, %arg1 : i32
    %c0_i32 = arith.constant 0 : i32
    %2 = arith.minsi %1, %c0_i32 : i32
    %c0_i32_0 = arith.constant 0 : i32
    %c0_i32_1 = arith.constant 0 : i32
    return %2, %c0_i32_0 : i32, i32
  }
  func.func @transform_8(%arg0: i32, %arg1: i32) -> (i32, i32, i32, i32) {
    %c0_i32 = arith.constant 0 : i32
    %c0_i32_0 = arith.constant 0 : i32
    %c0_i32_1 = arith.constant 0 : i32
    %c0_i32_2 = arith.constant 0 : i32
    return %arg0, %c0_i32, %c0_i32_0, %c0_i32_1 : i32, i32, i32, i32
  }
}

</mosaic_0001>

<bundles_post_ra>
// kernel: u2net_custom_loss.1
= control target key start
LH: loop header
LB: loop body
LE: loop exit
PB: predicated region body
PF: predicated region fallthrough
CT: control target
= control target key end

     0   :  { %v507_v11 = vlaneseq  ;;  %s873_s0 = inlined_call_operand.vmem [shape: f32[4,128], index: 0, kind: input, shape index: {}]   ;;  %s874_s1 = inlined_call_operand.vmem [shape: f32[4,128], index: 1, kind: input, shape index: {}]   ;;  %s875_s2 = inlined_call_operand.vmem [shape: f32[4,128], index: 2, kind: input, shape index: {}]   ;;  %s876_s3 = inlined_call_operand.vmem [shape: f32[4,128], index: 3, kind: input, shape index: {}]   ;;  %s877_s4 = inlined_call_operand.vmem [shape: f32[4,128], index: 4, kind: input, shape index: {}]   ;;  %s878_s5 = inlined_call_operand.vmem [shape: f32[4,128], index: 5, kind: input, shape index: {}]   ;;  %s879_s6 = inlined_call_operand.vmem [shape: f32[4,128], index: 6, kind: input, shape index: {}]   ;;  %s880_s7 = inlined_call_operand.vmem [shape: f32[4,128], index: 7, kind: input, shape index: {}]   ;;  %s881_s8 = inlined_call_operand.vmem [shape: f32[1,7,8,128], index: 8, kind: output, shape index: {}]  }
   0x1   :  { %v517_v0 = vld [vmem:[%s873_s0] sm:$0xff] }
   0x2   :  { %v534_v1 = vld [vmem:[%s874_s1] sm:$0xff]  ;;  %719 = vlog2.f32 %v517_v0  ;;  %v521_v4 = vsub.f32 1.0, %v517_v0  ;;  %v508_v14 = vshrl.u32 %v507_v11, 7  ;;  %v510_v19 = vand.u32 127, %v507_v11 }
   0x3   :  { %v552_v2 = vld [vmem:[%s875_s2] sm:$0xff]  ;;  %721 = vlog2.f32 %v534_v1  ;;  %v538_v5 = vsub.f32 1.0, %v534_v1 }
   0x4   :  { %v570_v3 = vld [vmem:[%s876_s3] sm:$0xff]  ;;  %v556_v6 = vsub.f32 1.0, %v552_v2  ;;  %723 = vlog2.f32 %v552_v2  ;;  %v511_v20 = vmul.u32 128, %v508_v14 }
   0x5   :  { %v588_v7 = vld [vmem:[%s877_s4] sm:$0xff]  ;;  %725 = vlog2.f32 %v521_v4  ;;  %v574_v8 = vsub.f32 1.0, %v570_v3 }
   0x6   :  { %727 = vlog2.f32 %v538_v5  ;;  %v606_v9 = vld [vmem:[%s878_s5] sm:$0xff]  ;;  %v592_v10 = vsub.f32 1.0, %v588_v7  ;;  %v821_v32 = vadd.s32 %v511_v20, %v510_v19 }
   0x7   :  { %729 = vlog2.f32 %v556_v6  ;;  %v610_v12 = vsub.f32 1.0, %v606_v9  ;;  %v624_v13 = vld [vmem:[%s879_s6] sm:$0xff] }
   0x8   :  { %731 = vlog2.f32 %v570_v3  ;;  %v628_v15 = vsub.f32 1.0, %v624_v13  ;;  %v816_v18 = vld [vmem:[%s880_s7] sm:$0xff]  ;;  %vm515_vm0 = vcmp.lt.s32.totalorder %v821_v32, 512 }
   0x9   :  { %733 = vlog2.f32 %v574_v8  ;;  %v819_v28 = vsub.f32 1.0, %v816_v18 }
   0xa   :  { %735 = vlog2.f32 %v588_v7 }
   0xb   :  { %737 = vlog2.f32 %v592_v10 }
   0xc   :  { %739 = vlog2.f32 %v606_v9 }
   0xd   :  { %741 = vlog2.f32 %v610_v12 }
   0xe   :  { %743 = vlog2.f32 %v624_v13 }
   0xf   :  { %v720_v16 = vpop.eup %719  ;;  %745 = vlog2.f32 %v628_v15 }
  0x10   :  { %v722_v17 = vpop.eup %721  ;;  %v519_v21 = vmul.f32 0.6931472, %v720_v16 }
  0x11   :  { %v724_v22 = vpop.eup %723  ;;  %v536_v23 = vmul.f32 0.6931472, %v722_v17 }
  0x12   :  { %v726_v24 = vpop.eup %725  ;;  %v520_v25 = vmax.f32 %v519_v21, -100.0  ;;  %v554_v26 = vmul.f32 0.6931472, %v724_v22 }
  0x13   :  { %v728_v27 = vpop.eup %727  ;;  %v523_v29 = vmul.f32 0.6931472, %v726_v24  ;;  %v537_v30 = vmax.f32 %v536_v23, -100.0 }
  0x14   :  { %v730_v31 = vpop.eup %729  ;;  %v540_v33 = vmul.f32 0.6931472, %v728_v27  ;;  %v555_v34 = vmax.f32 %v554_v26, -100.0  ;;  %v525_v37 = vmul.f32 %v520_v25, %v816_v18 }
  0x15   :  { %v732_v35 = vpop.eup %731  ;;  %v524_v36 = vmax.f32 %v523_v29, -100.0  ;;  %v558_v38 = vmul.f32 0.6931472, %v730_v31  ;;  %v542_v41 = vmul.f32 %v537_v30, %v816_v18 }
  0x16   :  { %v734_v39 = vpop.eup %733  ;;  %v541_v40 = vmax.f32 %v540_v33, -100.0  ;;  %v572_v42 = vmul.f32 0.6931472, %v732_v35  ;;  %v560_v46 = vmul.f32 %v555_v34, %v816_v18 }
  0x17   :  { %v736_v43 = vpop.eup %735  ;;  %v526_v44 = vmul.f32 %v524_v36, %v819_v28  ;;  %v559_v45 = vmax.f32 %v558_v38, -100.0  ;;  %v576_v47 = vmul.f32 0.6931472, %v734_v39 }
  0x18   :  { %v738_v48 = vpop.eup %737  ;;  %v543_v49 = vmul.f32 %v541_v40, %v819_v28  ;;  %v573_v50 = vmax.f32 %v572_v42, -100.0  ;;  %v590_v51 = vmul.f32 0.6931472, %v736_v43 }
  0x19   :  { %v740_v52 = vpop.eup %739  ;;  %v527_v53 = vadd.f32 %v526_v44, %v525_v37  ;;  %v561_v54 = vmul.f32 %v559_v45, %v819_v28  ;;  %v577_v55 = vmax.f32 %v576_v47, -100.0  ;;  %v594_v56 = vmul.f32 0.6931472, %v738_v48 }
  0x1a   :  { %v742_v57 = vpop.eup %741  ;;  %v544_v58 = vadd.f32 %v543_v49, %v542_v41  ;;  %v578_v59 = vmul.f32 %v573_v50, %v816_v18  ;;  %v591_v60 = vmax.f32 %v590_v51, -100.0  ;;  %v608_v61 = vmul.f32 0.6931472, %v740_v52 }
  0x1b   :  { %v528_v62 = vsub.f32 0.0, %v527_v53  ;;  %v562_v63 = vadd.f32 %v561_v54, %v560_v46  ;;  %v579_v0 = vmul.f32 %v577_v55, %v819_v28  ;;  %v595_v1 = vmax.f32 %v594_v56, -100.0  ;;  %v744_v2 = vpop.eup %743 }
  0x1c   :  { %v545_v3 = vsub.f32 0.0, %v544_v58  ;;  %v596_v4 = vmul.f32 %v591_v60, %v816_v18  ;;  %v609_v5 = vmax.f32 %v608_v61, -100.0  ;;  %v612_v6 = vmul.f32 0.6931472, %v742_v57  ;;  %v746_v7 = vpop.eup %745 }
  0x1d   :  { %v529_v8 = vsel %vm515_vm0, %v528_v62, 0.0  ;;  %v563_v9 = vsub.f32 0.0, %v562_v63  ;;  %v580_v10 = vadd.f32 %v579_v0, %v578_v59  ;;  %v597_v11 = vmul.f32 %v595_v1, %v819_v28 }
  0x1e   :  { %v546_v12 = vsel %vm515_vm0, %v545_v3, 0.0  ;;  %v613_v13 = vmax.f32 %v612_v6, -100.0  ;;  %v614_v14 = vmul.f32 %v609_v5, %v816_v18  ;;  %533 = vst [vmem:[%s881_s8] sm:$0xff] %v529_v8  ;;  %v626_v20 = vmul.f32 0.6931472, %v744_v2 }
  0x1f   :  { %v564_v15 = vsel %vm515_vm0, %v563_v9, 0.0  ;;  %v581_v16 = vsub.f32 0.0, %v580_v10  ;;  %v598_v17 = vadd.f32 %v597_v11, %v596_v4  ;;  %v630_v21 = vmul.f32 0.6931472, %v746_v7  ;;  %707 = vst [vmem:[%s881_s8 + $0x8] sm:$0xff] %v546_v12 }
  0x20   :  { %v615_v19 = vmul.f32 %v613_v13, %v819_v28  ;;  %709 = vst [vmem:[%s881_s8 + $0x10] sm:$0xff] %v564_v15  ;;  %v627_v25 = vmax.f32 %v626_v20, -100.0 }
  0x21   :  { %v582_v22 = vsel %vm515_vm0, %v581_v16, 0.0  ;;  %v599_v23 = vsub.f32 0.0, %v598_v17  ;;  %v631_v26 = vmax.f32 %v630_v21, -100.0 }
  0x22   :  { %v616_v24 = vadd.f32 %v615_v19, %v614_v14  ;;  %711 = vst [vmem:[%s881_s8 + $0x18] sm:$0xff] %v582_v22  ;;  %v632_v30 = vmul.f32 %v627_v25, %v816_v18 }
  0x23   :  { %v600_v27 = vsel %vm515_vm0, %v599_v23, 0.0  ;;  %v633_v31 = vmul.f32 %v631_v26, %v819_v28 }
  0x24   :  { %v617_v29 = vsub.f32 0.0, %v616_v24  ;;  %713 = vst [vmem:[%s881_s8 + $0x20] sm:$0xff] %v600_v27 }
  0x25   :  { %v634_v34 = vadd.f32 %v633_v31, %v632_v30 }
  0x26   :  { %v618_v33 = vsel %vm515_vm0, %v617_v29, 0.0 }
  0x27   :  { %v635_v35 = vsub.f32 0.0, %v634_v34  ;;  %715 = vst [vmem:[%s881_s8 + $0x28] sm:$0xff] %v618_v33 }
  0x29   :  { %v636_v36 = vsel %vm515_vm0, %v635_v35, 0.0 }
  0x2a   :  { %717 = vst [vmem:[%s881_s8 + $0x30] sm:$0xff] %v636_v36 }

</bundles_post_ra>
